<compile_context>
chip_gen: v6e
topology: v6e:2x2x1
jax: 0.10.0
libtpu: 0.0.40
codegen_flags: <defaults>
</compile_context>

<pallas_src>
import jax
import jax.numpy as jnp
from jax.experimental import pallas as pl
from jax.experimental.pallas import tpu as pltpu


def _copy_kernel(x_ref, o_ref):
    # Lane-dense (TB, TF) VMEM tile copy; nothing else happens in-kernel.
    o_ref[...] = x_ref[...]


def _choose_tiles(N, F, itemsize):
    """Pick (TB, TF): lane-dense along F (multiple of 128 or full F),
    sublane-aligned along N (multiple of 8 or the full small batch).
    Target ~2 MiB per tile so double-buffered in+out (~8 MiB total) fits
    comfortably under the scoped VMEM limit on v5e/v6e and v7x."""
    target_bytes = 2 * 1024 * 1024

    # Feature tile: keep the last dim a multiple of 128 for unmasked vst.
    if F % 128 == 0:
        tf_cap = max(128, (target_bytes // (8 * itemsize)) // 128 * 128)
        TF = min(F, tf_cap)
    else:
        TF = F  # full-extent block along F is always legal

    # Row tile: multiple of 8 sublanes, or the whole (small) batch.
    if N <= 8:
        TB = N
    else:
        rows = max(8, (target_bytes // max(1, TF * itemsize)) // 8 * 8)
        TB = min(N, rows)
    return TB, TF


def unflatten(x, C, H, W):
    """x: (N, C*H*W) -> (N, C, H, W). Same dtype, row-major (torch .view) semantics."""
    N, F = x.shape
    assert F == C * H * W, f"expected last dim {C * H * W}, got {F}"

    TB, TF = _choose_tiles(N, F, jnp.dtype(x.dtype).itemsize)
    grid = (pl.cdiv(N, TB), pl.cdiv(F, TF))

    flat = pl.pallas_call(
        _copy_kernel,
        out_shape=jax.ShapeDtypeStruct((N, F), x.dtype),
        grid_spec=pltpu.PrefetchScalarGridSpec(
            num_scalar_prefetch=0,
            grid=grid,
            in_specs=[pl.BlockSpec((TB, TF), lambda i, j: (i, j))],
            out_specs=pl.BlockSpec((TB, TF), lambda i, j: (i, j)),
        ),
        compiler_params=pltpu.CompilerParams(
            # Pure copy, no reduction axis: both grid dims parallel (lets v7x
            # shard grid steps across its two TensorCores when grid > 1).
            dimension_semantics=("parallel", "parallel"),
            # Safe on every generation (== v6e scoped default, > v5e's 16 MiB),
            # leaves headroom below v7x's 64 MiB physical VMEM.
            vmem_limit_bytes=32 * 1024 * 1024,
        ),
    )(x)

    # Zero-copy row-major reinterpretation, equivalent to torch x.view(N, C, H, W).
    return jnp.reshape(flat, (N, C, H, W))


if __name__ == "__main__":
    # Small shapes consistent with the module: N=2, C=4, H=8, W=8  (F = 256).
    N, C, H, W = 2, 4, 8, 8
    key = jax.random.PRNGKey(0)
    x = jax.random.normal(key, (N, C * H * W), dtype=jnp.float32)

    out = unflatten(x, C, H, W)
    out = jax.block_until_ready(out)

    # Reference: PyTorch x.view(N, C, H, W) == row-major reshape.
    ref = jnp.reshape(x, (N, C, H, W))
    assert out.shape == (N, C, H, W)
    assert out.dtype == x.dtype
    assert jnp.array_equal(out, ref)

    print("KERNEL_OK")
</pallas_src>

<mosaic_0001>
module attributes {stable_mosaic.version = 11 : i64} {
  func.func @_copy_kernel(%arg0: i32, %arg1: i32, %arg2: memref<2x256xf32, #tpu.memory_space<vmem>>, %arg3: memref<2x256xf32, #tpu.memory_space<vmem>>) attributes {dimension_semantics = [#tpu.dimension_semantics<parallel>, #tpu.dimension_semantics<parallel>], iteration_bounds = array<i64: 1, 1>, scalar_prefetch = 0 : i64, scratch_operands = 0 : i64, tpu.core_type = #tpu.core_type<tc>, window_params = [{transform_indices = @transform_0, window_bounds = array<i64: 2, 256>}, {transform_indices = @transform_1, window_bounds = array<i64: 2, 256>}]} {
    %c0 = arith.constant 0 : index
    %c0_0 = arith.constant 0 : index
    %0 = vector.load %arg2[%c0, %c0_0] : memref<2x256xf32, #tpu.memory_space<vmem>>, vector<2x256xf32>
    %c0_1 = arith.constant 0 : index
    %c0_2 = arith.constant 0 : index
    %1 = vector.load %arg3[%c0_1, %c0_2] : memref<2x256xf32, #tpu.memory_space<vmem>>, vector<2x256xf32>
    tpu.vector_store %arg3[%c0_1, %c0_2], %0 {strides = array<i32>} : memref<2x256xf32, #tpu.memory_space<vmem>>, vector<2x256xf32>,
    return
  }
  func.func @transform_0(%arg0: i32, %arg1: i32) -> (i32, i32) {
    %c0_i32 = arith.constant 0 : i32
    return %arg0, %arg1 : i32, i32
  }
  func.func @transform_1(%arg0: i32, %arg1: i32) -> (i32, i32) {
    %c0_i32 = arith.constant 0 : i32
    return %arg0, %arg1 : i32, i32
  }
}

</mosaic_0001>

<bundles_post_ra>
// kernel: tpu_custom_call.1
= control target key start
LH: loop header
LB: loop body
LE: loop exit
PB: predicated region body
PF: predicated region fallthrough
CT: control target
= control target key end

     0   :  { %6 = vsyncpa [#allocation3], 0  ;;  %s102_s0 = inlined_call_operand.hbm [shape: f32[2,256], index: 0, kind: input, shape index: {}]   ;;  %s103_s1 = inlined_call_operand.hbm [shape: f32[2,256], index: 1, kind: output, shape index: {}]  }
   0x1   :  { %7 = vsyncpa [#allocation4], 0  ;;  %s84_s6 = smov [#allocation2]  }
   0x2   :  { %s14_s7 = sshll.u32 %s84_s6, 4  ;;  %s15_s7 = int_to_ptr.vmem [resolvable:$true] %s14_s7 }
   0x3   :  { %s48_s8 = scalar_lea.vmem %s15_s7, 64  ;;  %p53_p1 = scmp.lt.s32.totalorder %s15_s7, %s15_s7 }
   0x4   :  { %p49_p0 = scmp.ne.s32.totalorder %s15_s7, %s48_s8  ;;  %p54_p2 = scmp.lt.s32.totalorder %s48_s8, %s48_s8 }
   0x6   :  { %p55_p3 = por %p54_p2, %p53_p1 }
   0x8   :  { %p56_p4 = pnand %p55_p3, %p49_p0 }
   0xa   :  { %59 = shalt.err (!%p56_p4)
}
   0xb   :  { %17 = dma.hbm_to_vmem [thread:$0]  %s102_s0, 64, %s15_s7, [#allocation3]  }
   0xc   :  { %80 = dma.done.wait [#allocation3], 64  }
   0xd   :  { %81 = vsyncadd [#allocation3], 4294967232  ;;  %s85_s11 = smov [#allocation5]   ;;  %v21_v0 = vld [vmem:[#allocation2] sm:$0xf] }
   0xe   :  { %s29_s12 = sshll.u32 %s85_s11, 4  ;;  %22 = vst [vmem:[#allocation5] sm:$0xf] %v21_v0  ;;  %s30_s12 = int_to_ptr.vmem [resolvable:$true] %s29_s12 }
   0xf   :  { %s60_s13 = scalar_lea.vmem %s30_s12, 64  ;;  %p65_p6 = scmp.lt.s32.totalorder %s30_s12, %s30_s12 }
  0x10   :  { %p61_p5 = scmp.ne.s32.totalorder %s30_s12, %s60_s13  ;;  %p66_p7 = scmp.lt.s32.totalorder %s60_s13, %s60_s13 }
  0x12   :  { %p67_p8 = por %p66_p7, %p65_p6 }
  0x14   :  { %p68_p9 = pnand %p67_p8, %p61_p5 }
  0x16   :  { %71 = shalt.err (!%p68_p9)
}
  0x17   :  { %32 = dma.vmem_to_hbm [thread:$0]  %s30_s12, 64, %s103_s1, [#allocation4]  }
  0x18   :  { %82 = dma.done.wait [#allocation4], 64  }
  0x19   :  { %83 = vsyncadd [#allocation4], 4294967232 }
  0x1a   :  { %36 = vsyncpa [#allocation3], 1 }
  0x1b   :  { %37 = vsyncpa [#allocation4], 1 }

</bundles_post_ra>
